<compile_context>
chip_gen: v5e
topology: v5e:2x2
jax: 0.10.0
libtpu: 0.0.40
codegen_flags: <defaults>
</compile_context>

<pallas_src>
import functools

import jax
import jax.numpy as jnp
from jax.experimental import pallas as pl
from jax.experimental.pallas import tpu as pltpu


def _double_conv_kernel(x_ref, m_ref, w1_ref, s1_ref, b1_ref,
                        w2_ref, s2_ref, b2_ref, o_ref,
                        *, H, W, imgs, cin, cin_pad, cout, cout_pad):
    """One grid step = both conv layers for a chunk of `imgs` images.

    x_ref : (imgs, Cin, H*W)       NCHW input chunk, spatial on lanes
    m_ref : (8, imgs*H*W)          0/1 validity masks of the 8 non-center taps
    w*_ref: (Cout, 9*Cpad) bf16    conv weights, taps folded into K (padded C)
    s*_ref: (Cout, 1)              folded BN scale (gamma / sqrt(var + eps))
    b*_ref: (Cout, 1)              folded BN shift (beta - mean * scale)
    o_ref : (imgs, Cout, H*W)      NCHW output chunk, spatial on lanes
    """
    HW = H * W
    NL = imgs * HW
    mask = m_ref[...]                                      # (8, NL) f32 0/1

    def conv3x3(x_f32, w_bf16):
        # x_f32: (Cpad, NL) f32 with zero rows for padded channels.
        # Build the im2col patch (9*Cpad, NL): tap (kh, kw) is a static lane
        # rotation by d = (kh-1)*W + (kw-1); out-of-image (and cross-image)
        # lanes are zeroed by the precomputed masks, so roll wrap-around and
        # image-boundary crossings never contribute.
        taps = []
        mi = 0
        for kh in range(3):
            for kw in range(3):
                d = (kh - 1) * W + (kw - 1)
                if d == 0:
                    taps.append(x_f32)                     # center tap
                else:
                    rolled = pltpu.roll(x_f32, (-d) % NL, axis=1)
                    taps.append(rolled * mask[mi:mi + 1, :])
                    mi += 1
        patch = jnp.concatenate(taps, axis=0).astype(jnp.bfloat16)
        # Single bf16 MXU matmul per layer, f32 accumulation.
        return jnp.dot(w_bf16, patch, preferred_element_type=jnp.float32)

    # Fold the image chunk onto the lane axis: (Cin, imgs*HW).
    if imgs == 1:
        x = x_ref[0].astype(jnp.float32)
    else:
        x = jnp.concatenate(
            [x_ref[i].astype(jnp.float32) for i in range(imgs)], axis=1)
    if cin_pad > cin:
        x = jnp.concatenate(
            [x, jnp.zeros((cin_pad - cin, NL), jnp.float32)], axis=0)

    y1 = conv3x3(x, w1_ref[...])                           # (Cout, NL) f32
    y1 = jnp.maximum(y1 * s1_ref[...] + b1_ref[...], 0.0)  # fused BN + ReLU
    if cout_pad > cout:
        y1 = jnp.concatenate(
            [y1, jnp.zeros((cout_pad - cout, NL), jnp.float32)], axis=0)

    y2 = conv3x3(y1, w2_ref[...])                          # (Cout, NL) f32
    y2 = jnp.maximum(y2 * s2_ref[...] + b2_ref[...], 0.0)

    # Lane-dense per-image stores (HW is a multiple of 128 here).
    for i in range(imgs):
        o_ref[i] = y2[:, i * HW:(i + 1) * HW].astype(o_ref.dtype)


def _imgs_per_step(B):
    # Keep >= 2 "parallel" grid points so v7x's two TensorCores both get work,
    # while folding the rest of the batch into the matmul N dim (v5e/v6e win).
    if B >= 2 and B % 2 == 0:
        return B // 2
    return 1


def _make_tap_masks(H, W, imgs):
    """(8, imgs*H*W) f32 0/1 masks for the 8 non-center taps (integer math)."""
    HW = H * W
    pos = jnp.arange(HW, dtype=jnp.int32)
    row = pos // W
    col = pos - row * W
    rows = []
    for kh in range(3):
        for kw in range(3):
            if kh == 1 and kw == 1:
                continue
            r = row + (kh - 1)
            c = col + (kw - 1)
            rows.append((r >= 0) & (r < H) & (c >= 0) & (c < W))
    mask = jnp.stack(rows, axis=0).astype(jnp.float32)      # (8, HW)
    return jnp.tile(mask, (1, imgs))                        # (8, imgs*HW)


def _double_conv_call(x_flat, mask, w1, s1, b1, w2, s2, b2, *, H, W, imgs):
    B, Cin, HW = x_flat.shape
    Cout = w1.shape[0]
    cin_pad = w1.shape[1] // 9
    cout_pad = w2.shape[1] // 9
    NL = imgs * HW
    nsteps = B // imgs

    kernel = functools.partial(
        _double_conv_kernel, H=H, W=W, imgs=imgs,
        cin=Cin, cin_pad=cin_pad, cout=Cout, cout_pad=cout_pad)

    flops = 2 * B * HW * 9 * (cin_pad * Cout + cout_pad * Cout)
    bytes_accessed = (4 * B * (Cin + Cout) * HW            # f32 in / out
                      + 2 * (w1.size + w2.size)            # bf16 weights
                      + 4 * (4 * Cout + 8 * NL))           # BN params + masks

    # VMEM budget: double-buffered in/out blocks + resident weights/masks
    # + bf16 patches + f32 activations, with 2x headroom; clamped so it stays
    # safe on v7x (64 MiB physical) while not capping v5e/v6e unnecessarily.
    need = (2 * 4 * imgs * (Cin + Cout) * HW                # in/out buffers
            + 2 * (w1.size + w2.size) + 4 * 8 * NL          # weights + masks
            + 2 * 9 * (cin_pad + cout_pad) * NL             # bf16 patches
            + 4 * 2 * max(Cout, cout_pad) * NL)             # f32 y1 / y2
    vmem_limit = int(min(max(2 * need, 16 * 1024 * 1024), 48 * 1024 * 1024))

    return pl.pallas_call(
        kernel,
        out_shape=jax.ShapeDtypeStruct((B, Cout, HW), x_flat.dtype),
        grid=(nsteps,),
        in_specs=[
            pl.BlockSpec((imgs, Cin, HW), lambda b: (b, 0, 0)),
            pl.BlockSpec((8, NL), lambda b: (0, 0)),
            pl.BlockSpec((Cout, 9 * cin_pad), lambda b: (0, 0)),
            pl.BlockSpec((Cout, 1), lambda b: (0, 0)),
            pl.BlockSpec((Cout, 1), lambda b: (0, 0)),
            pl.BlockSpec((Cout, 9 * cout_pad), lambda b: (0, 0)),
            pl.BlockSpec((Cout, 1), lambda b: (0, 0)),
            pl.BlockSpec((Cout, 1), lambda b: (0, 0)),
        ],
        out_specs=pl.BlockSpec((imgs, Cout, HW), lambda b: (b, 0, 0)),
        compiler_params=pltpu.CompilerParams(
            dimension_semantics=("parallel",),
            vmem_limit_bytes=vmem_limit),
        cost_estimate=pl.CostEstimate(
            flops=flops, transcendentals=0, bytes_accessed=bytes_accessed),
    )(x_flat, mask, w1, s1, b1, w2, s2, b2)


@jax.jit
def double_conv_forward(x_nchw, w1_k, s1, b1, w2_k, s2, b2):
    B, Cin, H, W = x_nchw.shape
    imgs = _imgs_per_step(B)
    # NCHW is row-major contiguous, so flattening (H, W) -> H*W is free.
    x_flat = x_nchw.reshape(B, Cin, H * W)
    mask = _make_tap_masks(H, W, imgs)
    y = _double_conv_call(x_flat, mask, w1_k, s1, b1, w2_k, s2, b2,
                          H=H, W=W, imgs=imgs)
    return y.reshape(B, y.shape[1], H, W)


def _round_up(n, m):
    return (n + m - 1) // m * m


def _repack_conv_weight(w_oihw, cin_pad):
    """OIHW -> (O, 9*cin_pad) bf16, K index = (kh*3+kw)*cin_pad + ci."""
    O, I, _, _ = w_oihw.shape
    w = jnp.transpose(w_oihw, (0, 2, 3, 1))                 # (O, kh, kw, ci)
    if cin_pad > I:
        w = jnp.pad(w, ((0, 0), (0, 0), (0, 0), (0, cin_pad - I)))
    return w.reshape(O, 9 * cin_pad).astype(jnp.bfloat16)


def init_params(key, in_ch, out_ch, eps=1e-5):
    ks = jax.random.split(key, 10)
    p = {}
    # Conv weights in PyTorch OIHW layout (kept f32 for the reference), then
    # repacked / channel-padded / bf16-cast for the kernel.
    w1 = jax.random.normal(ks[0], (out_ch, in_ch, 3, 3), jnp.float32) * 0.2
    w2 = jax.random.normal(ks[1], (out_ch, out_ch, 3, 3), jnp.float32) * 0.2
    p["w1_oihw"], p["w2_oihw"] = w1, w2
    p["w1_k"] = _repack_conv_weight(w1, _round_up(in_ch, 8))
    p["w2_k"] = _repack_conv_weight(w2, _round_up(out_ch, 8))
    # BatchNorm (inference-mode) parameters per layer, folded to scale/shift.
    for i, kbase in ((1, 2), (2, 6)):
        gamma = 0.5 + jax.random.uniform(ks[kbase], (out_ch,), jnp.float32)
        beta = jax.random.normal(ks[kbase + 1], (out_ch,), jnp.float32) * 0.1
        mean = jax.random.normal(ks[kbase + 2], (out_ch,), jnp.float32) * 0.1
        var = 0.5 + jax.random.uniform(ks[kbase + 3], (out_ch,), jnp.float32)
        p[f"bn{i}"] = (gamma, beta, mean, var)
        scale = gamma / jnp.sqrt(var + eps)
        p[f"s{i}"] = scale.reshape(out_ch, 1)
        p[f"b{i}"] = (beta - mean * scale).reshape(out_ch, 1)
    return p


def reference_forward(x_nchw, p, eps=1e-5):
    """Plain-JAX f32 reference matching PyTorch eval-mode semantics."""
    def conv(x, w):
        return jax.lax.conv_general_dilated(
            x, w, (1, 1), "SAME",
            dimension_numbers=("NCHW", "OIHW", "NCHW"))

    def bn_relu(x, bn):
        gamma, beta, mean, var = bn
        shp = (1, -1, 1, 1)
        y = (x - mean.reshape(shp)) / jnp.sqrt(var.reshape(shp) + eps)
        y = y * gamma.reshape(shp) + beta.reshape(shp)
        return jnp.maximum(y, 0.0)

    x = bn_relu(conv(x_nchw, p["w1_oihw"]), p["bn1"])
    x = bn_relu(conv(x, p["w2_oihw"]), p["bn2"])
    return x


if __name__ == "__main__":
    # B=4 exercises the batch-folded path (2 images per step, 2 grid steps).
    B, C_IN, C_OUT, H, W = 4, 4, 8, 16, 16
    key = jax.random.PRNGKey(0)
    kx, kp = jax.random.split(key)
    x = jax.random.normal(kx, (B, C_IN, H, W), jnp.float32)
    params = init_params(kp, C_IN, C_OUT)

    out = double_conv_forward(
        x, params["w1_k"], params["s1"], params["b1"],
        params["w2_k"], params["s2"], params["b2"])
    out = jax.block_until_ready(out)

    ref = jax.block_until_ready(reference_forward(x, params))
    assert out.shape == (B, C_OUT, H, W), out.shape
    # Tolerance reflects bf16 MXU inputs (f32 accumulation) vs the f32
    # reference: errors accumulate over 2 conv layers of K<=72 terms.
    err = jnp.abs(out - ref)
    assert jnp.allclose(out, ref, atol=1e-1, rtol=1e-1), float(err.max())
    assert float(err.mean()) < 3e-2, float(err.mean())

    print("KERNEL_OK")
</pallas_src>

<mosaic_0001>
module attributes {stable_mosaic.version = 11 : i64} {
  func.func @_double_conv_kernel(%arg0: i32, %arg1: memref<2x4x256xf32, #tpu.memory_space<vmem>>, %arg2: memref<8x512xf32, #tpu.memory_space<vmem>>, %arg3: memref<8x72xbf16, #tpu.memory_space<vmem>>, %arg4: memref<8x1xf32, #tpu.memory_space<vmem>>, %arg5: memref<8x1xf32, #tpu.memory_space<vmem>>, %arg6: memref<8x72xbf16, #tpu.memory_space<vmem>>, %arg7: memref<8x1xf32, #tpu.memory_space<vmem>>, %arg8: memref<8x1xf32, #tpu.memory_space<vmem>>, %arg9: memref<2x8x256xf32, #tpu.memory_space<vmem>>) attributes {dimension_semantics = [#tpu.dimension_semantics<parallel>], iteration_bounds = array<i64: 2>, scalar_prefetch = 0 : i64, scratch_operands = 0 : i64, tpu.core_type = #tpu.core_type<tc>, window_params = [{transform_indices = @transform_0, window_bounds = array<i64: 2, 4, 256>}, {pipeline_mode = #tpu.pipeline_mode<synchronous>, transform_indices = @transform_1, window_bounds = array<i64: 8, 512>}, {pipeline_mode = #tpu.pipeline_mode<synchronous>, transform_indices = @transform_2, window_bounds = array<i64: 8, 72>}, {pipeline_mode = #tpu.pipeline_mode<synchronous>, transform_indices = @transform_3, window_bounds = array<i64: 8, 1>}, {pipeline_mode = #tpu.pipeline_mode<synchronous>, transform_indices = @transform_4, window_bounds = array<i64: 8, 1>}, {pipeline_mode = #tpu.pipeline_mode<synchronous>, transform_indices = @transform_5, window_bounds = array<i64: 8, 72>}, {pipeline_mode = #tpu.pipeline_mode<synchronous>, transform_indices = @transform_6, window_bounds = array<i64: 8, 1>}, {pipeline_mode = #tpu.pipeline_mode<synchronous>, transform_indices = @transform_7, window_bounds = array<i64: 8, 1>}, {transform_indices = @transform_8, window_bounds = array<i64: 2, 8, 256>}]} {
    %c0 = arith.constant 0 : index
    %c0_0 = arith.constant 0 : index
    %0 = vector.load %arg2[%c0, %c0_0] : memref<8x512xf32, #tpu.memory_space<vmem>>, vector<8x512xf32>
    %c0_1 = arith.constant 0 : index
    %c0_2 = arith.constant 0 : index
    %c0_3 = arith.constant 0 : index
    %1 = vector.load %arg1[%c0_1, %c0_2, %c0_3] : memref<2x4x256xf32, #tpu.memory_space<vmem>>, vector<1x4x256xf32>
    %2 = vector.shape_cast %1 : vector<1x4x256xf32> to vector<4x256xf32>
    %c1 = arith.constant 1 : index
    %c0_4 = arith.constant 0 : index
    %c0_5 = arith.constant 0 : index
    %3 = vector.load %arg1[%c1, %c0_4, %c0_5] : memref<2x4x256xf32, #tpu.memory_space<vmem>>, vector<1x4x256xf32>
    %4 = vector.shape_cast %3 : vector<1x4x256xf32> to vector<4x256xf32>
    %5 = tpu.concatenate %2, %4 in 1 : vector<4x256xf32>, vector<4x256xf32> -> vector<4x512xf32>
    %cst = arith.constant 0.000000e+00 : f32
    %6 = vector.broadcast %cst : f32 to vector<4x512xf32>
    %7 = tpu.concatenate %5, %6 in 0 : vector<4x512xf32>, vector<4x512xf32> -> vector<8x512xf32>
    %c0_6 = arith.constant 0 : index
    %c0_7 = arith.constant 0 : index
    %8 = vector.load %arg3[%c0_6, %c0_7] : memref<8x72xbf16, #tpu.memory_space<vmem>>, vector<8x72xbf16>
    %c17_i32 = arith.constant 17 : i32
    %9 = tpu.dynamic_rotate %7 by %c17_i32 dim 1 : vector<8x512xf32>, i32 -> vector<8x512xf32>
    %10 = vector.extract_strided_slice %0 {offsets = [0, 0], sizes = [1, 512], strides = [1, 1]} : vector<8x512xf32> to vector<1x512xf32>
    %11 = vector.broadcast %10 : vector<1x512xf32> to vector<8x512xf32>
    %12 = arith.mulf %9, %11 : vector<8x512xf32>
    %c16_i32 = arith.constant 16 : i32
    %13 = tpu.dynamic_rotate %7 by %c16_i32 dim 1 : vector<8x512xf32>, i32 -> vector<8x512xf32>
    %14 = vector.extract_strided_slice %0 {offsets = [1, 0], sizes = [1, 512], strides = [1, 1]} : vector<8x512xf32> to vector<1x512xf32>
    %15 = vector.broadcast %14 : vector<1x512xf32> to vector<8x512xf32>
    %16 = arith.mulf %13, %15 : vector<8x512xf32>
    %c15_i32 = arith.constant 15 : i32
    %17 = tpu.dynamic_rotate %7 by %c15_i32 dim 1 : vector<8x512xf32>, i32 -> vector<8x512xf32>
    %18 = vector.extract_strided_slice %0 {offsets = [2, 0], sizes = [1, 512], strides = [1, 1]} : vector<8x512xf32> to vector<1x512xf32>
    %19 = vector.broadcast %18 : vector<1x512xf32> to vector<8x512xf32>
    %20 = arith.mulf %17, %19 : vector<8x512xf32>
    %c1_i32 = arith.constant 1 : i32
    %21 = tpu.dynamic_rotate %7 by %c1_i32 dim 1 : vector<8x512xf32>, i32 -> vector<8x512xf32>
    %22 = vector.extract_strided_slice %0 {offsets = [3, 0], sizes = [1, 512], strides = [1, 1]} : vector<8x512xf32> to vector<1x512xf32>
    %23 = vector.broadcast %22 : vector<1x512xf32> to vector<8x512xf32>
    %24 = arith.mulf %21, %23 : vector<8x512xf32>
    %c511_i32 = arith.constant 511 : i32
    %25 = tpu.dynamic_rotate %7 by %c511_i32 dim 1 : vector<8x512xf32>, i32 -> vector<8x512xf32>
    %26 = vector.extract_strided_slice %0 {offsets = [4, 0], sizes = [1, 512], strides = [1, 1]} : vector<8x512xf32> to vector<1x512xf32>
    %27 = vector.broadcast %26 : vector<1x512xf32> to vector<8x512xf32>
    %28 = arith.mulf %25, %27 : vector<8x512xf32>
    %c497_i32 = arith.constant 497 : i32
    %29 = tpu.dynamic_rotate %7 by %c497_i32 dim 1 : vector<8x512xf32>, i32 -> vector<8x512xf32>
    %30 = vector.extract_strided_slice %0 {offsets = [5, 0], sizes = [1, 512], strides = [1, 1]} : vector<8x512xf32> to vector<1x512xf32>
    %31 = vector.broadcast %30 : vector<1x512xf32> to vector<8x512xf32>
    %32 = arith.mulf %29, %31 : vector<8x512xf32>
    %c496_i32 = arith.constant 496 : i32
    %33 = tpu.dynamic_rotate %7 by %c496_i32 dim 1 : vector<8x512xf32>, i32 -> vector<8x512xf32>
    %34 = vector.extract_strided_slice %0 {offsets = [6, 0], sizes = [1, 512], strides = [1, 1]} : vector<8x512xf32> to vector<1x512xf32>
    %35 = vector.broadcast %34 : vector<1x512xf32> to vector<8x512xf32>
    %36 = arith.mulf %33, %35 : vector<8x512xf32>
    %c495_i32 = arith.constant 495 : i32
    %37 = tpu.dynamic_rotate %7 by %c495_i32 dim 1 : vector<8x512xf32>, i32 -> vector<8x512xf32>
    %38 = vector.extract_strided_slice %0 {offsets = [7, 0], sizes = [1, 512], strides = [1, 1]} : vector<8x512xf32> to vector<1x512xf32>
    %39 = vector.broadcast %38 : vector<1x512xf32> to vector<8x512xf32>
    %40 = arith.mulf %37, %39 : vector<8x512xf32>
    %41 = tpu.concatenate %12, %16, %20, %24, %7, %28, %32, %36, %40 in 0 : vector<8x512xf32>, vector<8x512xf32>, vector<8x512xf32>, vector<8x512xf32>, vector<8x512xf32>, vector<8x512xf32>, vector<8x512xf32>, vector<8x512xf32>, vector<8x512xf32> -> vector<72x512xf32>
    %42 = arith.truncf %41 : vector<72x512xf32> to vector<72x512xbf16>
    %cst_8 = arith.constant dense<0.000000e+00> : vector<8x512xf32>
    %43 = tpu.matmul %8, %42, %cst_8 {dimension_numbers = #tpu.dot_dimension_numbers<[1], [0], [0], [1], [0, 0, 1, 1], [], []>} : vector<8x72xbf16>, vector<72x512xbf16>, vector<8x512xf32> -> vector<8x512xf32>
    %c0_9 = arith.constant 0 : index
    %c0_10 = arith.constant 0 : index
    %44 = vector.load %arg4[%c0_9, %c0_10] : memref<8x1xf32, #tpu.memory_space<vmem>>, vector<8x1xf32>
    %45 = vector.broadcast %44 : vector<8x1xf32> to vector<8x512xf32>
    %46 = arith.mulf %43, %45 : vector<8x512xf32>
    %c0_11 = arith.constant 0 : index
    %c0_12 = arith.constant 0 : index
    %47 = vector.load %arg5[%c0_11, %c0_12] : memref<8x1xf32, #tpu.memory_space<vmem>>, vector<8x1xf32>
    %48 = vector.broadcast %47 : vector<8x1xf32> to vector<8x512xf32>
    %49 = arith.addf %46, %48 : vector<8x512xf32>
    %cst_13 = arith.constant 0.000000e+00 : f32
    %50 = vector.broadcast %cst_13 : f32 to vector<8x512xf32>
    %51 = arith.maximumf %49, %50 : vector<8x512xf32>
    %c0_14 = arith.constant 0 : index
    %c0_15 = arith.constant 0 : index
    %52 = vector.load %arg6[%c0_14, %c0_15] : memref<8x72xbf16, #tpu.memory_space<vmem>>, vector<8x72xbf16>
    %c17_i32_16 = arith.constant 17 : i32
    %53 = tpu.dynamic_rotate %51 by %c17_i32_16 dim 1 : vector<8x512xf32>, i32 -> vector<8x512xf32>
    %54 = vector.extract_strided_slice %0 {offsets = [0, 0], sizes = [1, 512], strides = [1, 1]} : vector<8x512xf32> to vector<1x512xf32>
    %55 = vector.broadcast %54 : vector<1x512xf32> to vector<8x512xf32>
    %56 = arith.mulf %53, %55 : vector<8x512xf32>
    %c16_i32_17 = arith.constant 16 : i32
    %57 = tpu.dynamic_rotate %51 by %c16_i32_17 dim 1 : vector<8x512xf32>, i32 -> vector<8x512xf32>
    %58 = vector.extract_strided_slice %0 {offsets = [1, 0], sizes = [1, 512], strides = [1, 1]} : vector<8x512xf32> to vector<1x512xf32>
    %59 = vector.broadcast %58 : vector<1x512xf32> to vector<8x512xf32>
    %60 = arith.mulf %57, %59 : vector<8x512xf32>
    %c15_i32_18 = arith.constant 15 : i32
    %61 = tpu.dynamic_rotate %51 by %c15_i32_18 dim 1 : vector<8x512xf32>, i32 -> vector<8x512xf32>
    %62 = vector.extract_strided_slice %0 {offsets = [2, 0], sizes = [1, 512], strides = [1, 1]} : vector<8x512xf32> to vector<1x512xf32>
    %63 = vector.broadcast %62 : vector<1x512xf32> to vector<8x512xf32>
    %64 = arith.mulf %61, %63 : vector<8x512xf32>
    %c1_i32_19 = arith.constant 1 : i32
    %65 = tpu.dynamic_rotate %51 by %c1_i32_19 dim 1 : vector<8x512xf32>, i32 -> vector<8x512xf32>
    %66 = vector.extract_strided_slice %0 {offsets = [3, 0], sizes = [1, 512], strides = [1, 1]} : vector<8x512xf32> to vector<1x512xf32>
    %67 = vector.broadcast %66 : vector<1x512xf32> to vector<8x512xf32>
    %68 = arith.mulf %65, %67 : vector<8x512xf32>
    %c511_i32_20 = arith.constant 511 : i32
    %69 = tpu.dynamic_rotate %51 by %c511_i32_20 dim 1 : vector<8x512xf32>, i32 -> vector<8x512xf32>
    %70 = vector.extract_strided_slice %0 {offsets = [4, 0], sizes = [1, 512], strides = [1, 1]} : vector<8x512xf32> to vector<1x512xf32>
    %71 = vector.broadcast %70 : vector<1x512xf32> to vector<8x512xf32>
    %72 = arith.mulf %69, %71 : vector<8x512xf32>
    %c497_i32_21 = arith.constant 497 : i32
    %73 = tpu.dynamic_rotate %51 by %c497_i32_21 dim 1 : vector<8x512xf32>, i32 -> vector<8x512xf32>
    %74 = vector.extract_strided_slice %0 {offsets = [5, 0], sizes = [1, 512], strides = [1, 1]} : vector<8x512xf32> to vector<1x512xf32>
    %75 = vector.broadcast %74 : vector<1x512xf32> to vector<8x512xf32>
    %76 = arith.mulf %73, %75 : vector<8x512xf32>
    %c496_i32_22 = arith.constant 496 : i32
    %77 = tpu.dynamic_rotate %51 by %c496_i32_22 dim 1 : vector<8x512xf32>, i32 -> vector<8x512xf32>
    %78 = vector.extract_strided_slice %0 {offsets = [6, 0], sizes = [1, 512], strides = [1, 1]} : vector<8x512xf32> to vector<1x512xf32>
    %79 = vector.broadcast %78 : vector<1x512xf32> to vector<8x512xf32>
    %80 = arith.mulf %77, %79 : vector<8x512xf32>
    %c495_i32_23 = arith.constant 495 : i32
    %81 = tpu.dynamic_rotate %51 by %c495_i32_23 dim 1 : vector<8x512xf32>, i32 -> vector<8x512xf32>
    %82 = vector.extract_strided_slice %0 {offsets = [7, 0], sizes = [1, 512], strides = [1, 1]} : vector<8x512xf32> to vector<1x512xf32>
    %83 = vector.broadcast %82 : vector<1x512xf32> to vector<8x512xf32>
    %84 = arith.mulf %81, %83 : vector<8x512xf32>
    %85 = tpu.concatenate %56, %60, %64, %68, %51, %72, %76, %80, %84 in 0 : vector<8x512xf32>, vector<8x512xf32>, vector<8x512xf32>, vector<8x512xf32>, vector<8x512xf32>, vector<8x512xf32>, vector<8x512xf32>, vector<8x512xf32>, vector<8x512xf32> -> vector<72x512xf32>
    %86 = arith.truncf %85 : vector<72x512xf32> to vector<72x512xbf16>
    %cst_24 = arith.constant dense<0.000000e+00> : vector<8x512xf32>
    %87 = tpu.matmul %52, %86, %cst_24 {dimension_numbers = #tpu.dot_dimension_numbers<[1], [0], [0], [1], [0, 0, 1, 1], [], []>} : vector<8x72xbf16>, vector<72x512xbf16>, vector<8x512xf32> -> vector<8x512xf32>
    %c0_25 = arith.constant 0 : index
    %c0_26 = arith.constant 0 : index
    %88 = vector.load %arg7[%c0_25, %c0_26] : memref<8x1xf32, #tpu.memory_space<vmem>>, vector<8x1xf32>
    %89 = vector.broadcast %88 : vector<8x1xf32> to vector<8x512xf32>
    %90 = arith.mulf %87, %89 : vector<8x512xf32>
    %c0_27 = arith.constant 0 : index
    %c0_28 = arith.constant 0 : index
    %91 = vector.load %arg8[%c0_27, %c0_28] : memref<8x1xf32, #tpu.memory_space<vmem>>, vector<8x1xf32>
    %92 = vector.broadcast %91 : vector<8x1xf32> to vector<8x512xf32>
    %93 = arith.addf %90, %92 : vector<8x512xf32>
    %cst_29 = arith.constant 0.000000e+00 : f32
    %94 = vector.broadcast %cst_29 : f32 to vector<8x512xf32>
    %95 = arith.maximumf %93, %94 : vector<8x512xf32>
    %96 = vector.extract_strided_slice %95 {offsets = [0, 0], sizes = [8, 256], strides = [1, 1]} : vector<8x512xf32> to vector<8x256xf32>
    %c0_30 = arith.constant 0 : index
    %c0_31 = arith.constant 0 : index
    %c0_32 = arith.constant 0 : index
    %97 = vector.load %arg9[%c0_30, %c0_31, %c0_32] : memref<2x8x256xf32, #tpu.memory_space<vmem>>, vector<1x8x256xf32>
    %98 = vector.shape_cast %97 : vector<1x8x256xf32> to vector<8x256xf32>
    %99 = vector.shape_cast %96 : vector<8x256xf32> to vector<1x8x256xf32>
    tpu.vector_store %arg9[%c0_30, %c0_31, %c0_32], %99 {strides = array<i32>} : memref<2x8x256xf32, #tpu.memory_space<vmem>>, vector<1x8x256xf32>,
    %100 = vector.extract_strided_slice %95 {offsets = [0, 256], sizes = [8, 256], strides = [1, 1]} : vector<8x512xf32> to vector<8x256xf32>
    %c1_33 = arith.constant 1 : index
    %c0_34 = arith.constant 0 : index
    %c0_35 = arith.constant 0 : index
    %101 = vector.load %arg9[%c1_33, %c0_34, %c0_35] : memref<2x8x256xf32, #tpu.memory_space<vmem>>, vector<1x8x256xf32>
    %102 = vector.shape_cast %101 : vector<1x8x256xf32> to vector<8x256xf32>
    %103 = vector.shape_cast %100 : vector<8x256xf32> to vector<1x8x256xf32>
    tpu.vector_store %arg9[%c1_33, %c0_34, %c0_35], %103 {strides = array<i32>} : memref<2x8x256xf32, #tpu.memory_space<vmem>>, vector<1x8x256xf32>,
    return
  }
  func.func @transform_0(%arg0: i32) -> (i32, i32, i32) {
    %c0_i32 = arith.constant 0 : i32
    %c0_i32_0 = arith.constant 0 : i32
    %c0_i32_1 = arith.constant 0 : i32
    return %arg0, %c0_i32, %c0_i32_0 : i32, i32, i32
  }
  func.func @transform_1(%arg0: i32) -> (i32, i32) {
    %c0_i32 = arith.constant 0 : i32
    %c0_i32_0 = arith.constant 0 : i32
    %c0_i32_1 = arith.constant 0 : i32
    return %c0_i32, %c0_i32_0 : i32, i32
  }
  func.func @transform_2(%arg0: i32) -> (i32, i32) {
    %c0_i32 = arith.constant 0 : i32
    %c0_i32_0 = arith.constant 0 : i32
    %c0_i32_1 = arith.constant 0 : i32
    return %c0_i32, %c0_i32_0 : i32, i32
  }
  func.func @transform_3(%arg0: i32) -> (i32, i32) {
    %c0_i32 = arith.constant 0 : i32
    %c0_i32_0 = arith.constant 0 : i32
    %c0_i32_1 = arith.constant 0 : i32
    return %c0_i32, %c0_i32_0 : i32, i32
  }
  func.func @transform_4(%arg0: i32) -> (i32, i32) {
    %c0_i32 = arith.constant 0 : i32
    %c0_i32_0 = arith.constant 0 : i32
    %c0_i32_1 = arith.constant 0 : i32
    return %c0_i32, %c0_i32_0 : i32, i32
  }
  func.func @transform_5(%arg0: i32) -> (i32, i32) {
    %c0_i32 = arith.constant 0 : i32
    %c0_i32_0 = arith.constant 0 : i32
    %c0_i32_1 = arith.constant 0 : i32
    return %c0_i32, %c0_i32_0 : i32, i32
  }
  func.func @transform_6(%arg0: i32) -> (i32, i32) {
    %c0_i32 = arith.constant 0 : i32
    %c0_i32_0 = arith.constant 0 : i32
    %c0_i32_1 = arith.constant 0 : i32
    return %c0_i32, %c0_i32_0 : i32, i32
  }
  func.func @transform_7(%arg0: i32) -> (i32, i32) {
    %c0_i32 = arith.constant 0 : i32
    %c0_i32_0 = arith.constant 0 : i32
    %c0_i32_1 = arith.constant 0 : i32
    return %c0_i32, %c0_i32_0 : i32, i32
  }
  func.func @transform_8(%arg0: i32) -> (i32, i32, i32) {
    %c0_i32 = arith.constant 0 : i32
    %c0_i32_0 = arith.constant 0 : i32
    %c0_i32_1 = arith.constant 0 : i32
    return %arg0, %c0_i32, %c0_i32_0 : i32, i32, i32
  }
}

</mosaic_0001>

<bundles_post_ra>
// kernel: double_conv_forward.1
= control target key start
LH: loop header
LB: loop body
LE: loop exit
PB: predicated region body
PF: predicated region fallthrough
CT: control target
= control target key end

     0   :  { %s1047_s27 = smov 0   ;;  %s1613_s0 = inlined_call_operand.vmem [shape: f32[4,4,256], index: 0, kind: input, shape index: {}]   ;;  %s1614_s1 = inlined_call_operand.vmem [shape: f32[8,512], index: 1, kind: input, shape index: {}]   ;;  %s1615_s2 = inlined_call_operand.vmem [shape: bf16[8,72], index: 2, kind: input, shape index: {}]   ;;  %s1616_s3 = inlined_call_operand.vmem [shape: f32[8,1], index: 3, kind: input, shape index: {}]   ;;  %s1617_s4 = inlined_call_operand.vmem [shape: f32[8,1], index: 4, kind: input, shape index: {}]   ;;  %s1618_s5 = inlined_call_operand.vmem [shape: bf16[8,72], index: 5, kind: input, shape index: {}]   ;;  %s1619_s6 = inlined_call_operand.vmem [shape: f32[8,1], index: 6, kind: input, shape index: {}]   ;;  %s1620_s7 = inlined_call_operand.vmem [shape: f32[8,1], index: 7, kind: input, shape index: {}]   ;;  %s1621_s8 = inlined_call_operand.vmem [shape: f32[4,8,256], index: 8, kind: output, shape index: {}]  }
   0x1 LB: > { %s925_s28 = sadd.s32 4294967295, %s990_s27   ;;  %p929_p0 = scmp.ge.s32.totalorder %s990_s27, 1  ;;  %s990_s27 = sphi %s1047_s27, %s18_s27  }
   0x2   : > { %p264_p1 = scmp.lt.s32.totalorder %s990_s27, 3 }
   0x4   : > { %p265_p2 = pnand %p929_p0, %p264_p1 }
   0x5   : > { %s930_s29 = sshll.u32 (!%p265_p2), %s925_s28, 1  ;;  %s992_s12 = smov (!%p265_p2), 113  }
   0x6   : > { %268 = sbr.rel (%p265_p2) target bundleno = 701 (0x2bd), region = 52  ;;  %p301_p3 = scmp.lt.s32.totalorder (!%p265_p2), %s930_s29, 3 }
   0x7   : > { %s993_s13 = smov (!%p265_p2), 111   ;;  %s994_s14 = smov (!%p265_p2), 127  }
   0x8   : > { %s995_s15 = smov (!%p265_p2), 112   ;;  %s996_s16 = smov (!%p265_p2), 15  }
   0x9   : > { %s997_s17 = smov (!%p265_p2), 1   ;;  %s998_s18 = smov (!%p265_p2), 17  }
   0xa   : > { %s999_s19 = smov (!%p265_p2), 16  }
   0xb   : > { %s1625_s29 = smov (!%p301_p3, %s930_s29), 3  ;;  %vm334_vm0 = vcmask 1043456   ;;  %v348_v15 = vlaneseq  ;;  %v1120_v19 = vld [vmem:[%s1614_s1] sm:$0xff]  ;;  %v1127_v21 = vld [vmem:[%s1614_s1 + $0x18] sm:$0xff]  ;;  %v1149_v34 = vld [vmem:[%s1614_s1 + $0x8] sm:$0xff]  ;;  %vm1000_vm5 = vmmov 1  }
   0xc   : > { %s961_s30 = sshll.u32 %s1625_s29, 3  ;;  %v502_v22 = vperm.slane %v1120_v19, 7  ;;  %v505_v23 = vperm.slane %v1127_v21, 7  ;;  %v484_v26 = vperm.slane %v1127_v21, 6  ;;  %v463_v33 = vperm.slane %v1127_v21, 5  ;;  %v1154_v35 = vld [vmem:[%s1614_s1 + $0x10] sm:$0xff]  ;;  %vm1228_vm6 = vmpackc.low %vm1000_vm5, %vm334_vm0 }
   0xd   : > { %s305_s11 = scalar_lea.vmem %s1613_s0, %s961_s30  ;;  %v1122_v20 = vand.u32 127, %v348_v15  ;;  %v503_v42 = vperm.slane %v1149_v34, 7  ;;  %v504_v43 = vperm.slane %v1154_v35, 7  ;;  %v462_v44 = vperm.slane %v1154_v35, 5 }
   0xe   : > { %v319_v0 = vld [vmem:[%s305_s11] sm:$0xff]  ;;  %v936_v1 = vld [vmem:[%s305_s11 + $0x8] sm:$0xff]  ;;  %v483_v47 = vperm.slane %v1154_v35, 6  ;;  %v481_v58 = vperm.slane %v1120_v19, 6  ;;  %v482_v59 = vperm.slane %v1149_v34, 6  ;;  %v460_v63 = vperm.slane %v1120_v19, 5 }
   0xf   : > { %323 = vst [vmem:[#allocation1] ss:$2 sm:$0xff] %v319_v0  ;;  %vm497_vm1 = vcmp.lt.s32.totalorder %v1122_v20, 111  ;;  %vm476_vm2 = vcmp.lt.s32.totalorder %v1122_v20, 112  ;;  %vm455_vm3 = vcmp.lt.s32.totalorder %v1122_v20, 113  ;;  %vm434_vm4 = vcmp.lt.s32.totalorder %v1122_v20, 127 }
  0x10   : > { %vm392_vm7 = vcmp.lt.s32.totalorder %v1122_v20, 15  ;;  %vm413_vm8 = vcmp.lt.s32.totalorder %v1122_v20, 1  ;;  %vm350_vm9 = vcmp.lt.s32.totalorder %v1122_v20, 17  ;;  %vm371_vm10 = vcmp.lt.s32.totalorder %v1122_v20, 16 }
  0x11   : > { %vm530_vm11 = vcmask 588800  }
  0x16   : > { %v1061_v2 = vld.sshfl [vmem:[#allocation1] sm:$0xff pattern:$0x75316420]  ;;  %v1063_v3 = vld.sshfl [vmem:[#allocation1 + $0x8] sm:$0xff pattern:$0x75316420] }
  0x17   : > { %v335_v4 = vsel %vm334_vm0, %v1061_v2, 0.0  ;;  %329 = vst [vmem:[#allocation1] ss:$2 sm:$0xff] %v936_v1  ;;  %v336_v8 = vsel %vm334_vm0, %v1063_v3, 0.0 }
  0x18   : > { %447 = vrot.lane.b32.xlu1 %v335_v4, %s992_s12  ;;  %489 = vrot.lane.b32.xlu0 %v335_v4, %s993_s13 }
  0x1e   : > { %v1069_v5 = vld.sshfl [vmem:[#allocation1] sm:$0xff pattern:$0x75316420]  ;;  %v1076_v7 = vld.sshfl [vmem:[#allocation1 + $0x8] sm:$0xff pattern:$0x75316420] }
  0x1f   : > { %v337_v6 = vsel %vm334_vm0, %v1069_v5, 0.0  ;;  %v338_v9 = vsel %vm334_vm0, %v1076_v7, 0.0 }
  0x20   : > { %426 = vrot.lane.b32.xlu1 %v335_v4, %s994_s14  ;;  %468 = vrot.lane.b32.xlu0 %v335_v4, %s995_s15 }
  0x21   : > { %451 = vrot.lane.b32.xlu2 %v337_v6, %s992_s12 }
  0x28   : > { %491 = vrot.lane.b32.xlu0 %v336_v8, %s993_s13  ;;  %495 = vrot.lane.b32.xlu1 %v338_v9, %s993_s13 }
  0x29   : > { %453 = vrot.lane.b32.xlu2 %v338_v9, %s992_s12 }
  0x30   : > { %472 = vrot.lane.b32.xlu1 %v337_v6, %s995_s15  ;;  %493 = vrot.lane.b32.xlu0 %v337_v6, %s993_s13 }
  0x31   : > { %474 = vrot.lane.b32.xlu2 %v338_v9, %s995_s15 }
  0x38   : > { %449 = vrot.lane.b32.xlu1 %v336_v8, %s992_s12  ;;  %432 = vrot.lane.b32.xlu0 %v338_v9, %s994_s14 }
  0x39   : > { %430 = vrot.lane.b32.xlu2 %v337_v6, %s994_s14 }
  0x40   : > { %388 = vrot.lane.b32.xlu1 %v337_v6, %s996_s16  ;;  %386 = vrot.lane.b32.xlu0 %v336_v8, %s996_s16 }
  0x41   : > { %470 = vrot.lane.b32.xlu2 %v336_v8, %s995_s15 }
  0x48   : > { %409 = vrot.lane.b32.xlu1 %v337_v6, %s997_s17  ;;  %407 = vrot.lane.b32.xlu0 %v336_v8, %s997_s17 }
  0x49   : > { %390 = vrot.lane.b32.xlu2 %v338_v9, %s996_s16 }
  0x50   : > { %342 = vrot.lane.b32.xlu1 %v336_v8, %s998_s18  ;;  %428 = vrot.lane.b32.xlu0 %v336_v8, %s994_s14 }
  0x51   : > { %411 = vrot.lane.b32.xlu2 %v338_v9, %s997_s17 }
  0x58   : > { %365 = vrot.lane.b32.xlu1 %v336_v8, %s999_s19  ;;  %346 = vrot.lane.b32.xlu0 %v338_v9, %s998_s18 }
  0x59   : > { %344 = vrot.lane.b32.xlu2 %v337_v6, %s998_s18 }
  0x60   : > { %384 = vrot.lane.b32.xlu1 %v335_v4, %s996_s16  ;;  %369 = vrot.lane.b32.xlu0 %v338_v9, %s999_s19  ;;  %v441_v9 = vperm.slane %v1154_v35, 4 }
  0x61   : > { %367 = vrot.lane.b32.xlu2 %v337_v6, %s999_s19 }
  0x68   : > { %363 = vrot.lane.b32.xlu1 %v335_v4, %s999_s19  ;;  %340 = vrot.lane.b32.xlu0 %v335_v4, %s998_s18 }
  0x69   : > { %405 = vrot.lane.b32.xlu2 %v335_v4, %s997_s17  ;;  %v461_v4 = vperm.slane %v1149_v34, 5 }
  0x7b   : > { %v1109_v10 = vpop.permute.xlu2 %451 }
  0x83   : > { %v454_v11 = vpop.permute.xlu2 %453 }
  0x84   : > { %v456_v46 = vsel %vm455_vm3, %v1109_v10, %v454_v11 }
  0x85   : > { %v466_v57 = vmul.f32 %v462_v44, %v456_v46  ;;  %v400_v46 = vperm.slane %v1127_v21, 2 }
  0x8a   : > { %v1111_v12 = vpop.permute.xlu1 %447  ;;  %v490_v13 = vpop.permute.xlu0 %489 }
  0x8b   : > { %v475_v14 = vpop.permute.xlu2 %474  ;;  %v459_v36 = vsel %vm455_vm3, %v454_v11, %v1111_v12  ;;  %v442_v11 = vperm.slane %v1127_v21, 4 }
  0x8c   : > { %v467_v45 = vmul.f32 %v463_v33, %v459_v36 }
  0x92   : > { %v1113_v16 = vpop.permute.xlu1 %426  ;;  %v469_v17 = vpop.permute.xlu0 %468 }
  0x93   : > { %v1115_v18 = vpop.permute.xlu2 %430  ;;  %v480_v30 = vsel %vm476_vm2, %v475_v14, %v469_v17 }
  0x94   : > { %v488_v39 = vmul.f32 %v484_v26, %v480_v30 }
  0x96   : > { %v525_v54 = vpack.c.bf16 %v488_v39, %v467_v45 }
  0x9a   : > { %v492_v24 = vpop.permute.xlu0 %491  ;;  %v496_v25 = vpop.permute.xlu1 %495 }
  0x9b   : > { %v500_v27 = vsel %vm497_vm1, %v490_v13, %v492_v24  ;;  %v501_v28 = vsel %vm497_vm1, %v496_v25, %v490_v13  ;;  %v471_v29 = vpop.permute.xlu2 %470 }
  0x9c   : > { %v506_v31 = vmul.f32 %v502_v22, %v500_v27  ;;  %v509_v32 = vmul.f32 %v505_v23, %v501_v28  ;;  %v479_v0 = vsel %vm476_vm2, %v469_v17, %v471_v29 }
  0x9d   : > { %v485_v13 = vmul.f32 %v481_v58, %v479_v0 }
  0x9e   : > { %v526_v37 = vpack.c.bf16 %v506_v31, %v506_v31  ;;  %v529_v38 = vpack.c.bf16 %v509_v32, %v509_v32 }
  0xa0   : > { %v535_v40 = vsel %vm334_vm0, %v526_v37, 0  ;;  %v544_v41 = vsel %vm334_vm0, %v529_v38, 0 }
  0xa1   : > { %549 = vmatpush.bf16.msra.mxu0 %v535_v40  ;;  %588 = vmatpush.bf16.msra.mxu3 %v544_v41 }
  0xa2   : > { %v473_v48 = vpop.permute.xlu1 %472  ;;  %v494_v49 = vpop.permute.xlu0 %493 }
  0xa3   : > { %v477_v50 = vsel %vm476_vm2, %v473_v48, %v475_v14  ;;  %v1174_v51 = vpop.permute.xlu2 %390  ;;  %v498_v52 = vsel %vm497_vm1, %v494_v49, %v496_v25  ;;  %v499_v53 = vsel %vm497_vm1, %v492_v24, %v494_v49  ;;  %v478_v1 = vsel %vm476_vm2, %v471_v29, %v473_v48 }
  0xa4   : > { %v507_v55 = vmul.f32 %v503_v42, %v499_v53  ;;  %v508_v56 = vmul.f32 %v504_v43, %v498_v52  ;;  %v487_v60 = vmul.f32 %v483_v47, %v477_v50  ;;  %v486_v14 = vmul.f32 %v482_v59, %v478_v1 }
  0xa5   : > { %589 = vmatpush.bf16.msra.mxu3 %v525_v54  ;;  %v420_v49 = vperm.slane %v1154_v35, 3 }
  0xa6   : > { %v527_v61 = vpack.c.bf16 %v507_v55, %v507_v55  ;;  %v528_v62 = vpack.c.bf16 %v508_v56, %v508_v56  ;;  %v524_v24 = vpack.c.bf16 %v487_v60, %v466_v57 }
  0xa8   : > { %v538_v6 = vsel %vm334_vm0, %v527_v61, 0  ;;  %v541_v8 = vsel %vm334_vm0, %v528_v62, 0 }
  0xa9   : > { %562 = vmatpush.bf16.msra.mxu1 %v538_v6  ;;  %575 = vmatpush.bf16.msra.mxu2 %v541_v8  ;;  %v439_v6 = vperm.slane %v1120_v19, 4 }
  0xaa   : > { %v450_v15 = vpop.permute.xlu1 %449  ;;  %v433_v17 = vpop.permute.xlu0 %432 }
  0xab   : > { %v457_v25 = vsel %vm455_vm3, %v450_v15, %v1109_v10  ;;  %v458_v27 = vsel %vm455_vm3, %v1111_v12, %v450_v15  ;;  %v435_v28 = vsel %vm434_vm4, %v1115_v18, %v433_v17  ;;  %v438_v29 = vsel %vm434_vm4, %v433_v17, %v1113_v16  ;;  %v1225_v32 = vpop.permute.xlu2 %411 }
  0xac   : > { %v464_v30 = vmul.f32 %v460_v63, %v458_v27  ;;  %v465_v31 = vmul.f32 %v461_v4, %v457_v25  ;;  %v445_v10 = vmul.f32 %v441_v9, %v435_v28  ;;  %v446_v12 = vmul.f32 %v442_v11, %v438_v29  ;;  %v608_v25 = vld [vmem:[%s1617_s4] sm:$0xff] }
  0xad   : > { %576 = vmatpush.bf16.msra.mxu2 %v524_v24  ;;  %v598_v27 = vld [vmem:[%s1616_s3] sm:$0xff]  ;;  %v1001_v29 = vmov 0  }
  0xae   : > { %v522_v36 = vpack.c.bf16 %v485_v13, %v464_v30  ;;  %v523_v37 = vpack.c.bf16 %v486_v14, %v465_v31  ;;  %v950_v39 = vpack.c.bf16 %v446_v12, %v1076_v7  ;;  %v946_v40 = vpack.c.bf16 %v445_v10, %v1069_v5  ;;  %982 = vset.pattern.permute.xlu0 %v1001_v29 }
  0xaf   : > { %v399_v7 = vperm.slane %v1154_v35, 2  ;;  %v421_v5 = vperm.slane %v1127_v21, 3  ;;  %v440_v13 = vperm.slane %v1149_v34, 4  ;;  %611 = vperm.xlu0 %982, %v608_v25   ;;  %981 = vset.pattern.permute.xlu2 %v1001_v29  ;;  %v357_v31 = vperm.slane %v1154_v35, 0 }
  0xb0   : > { %550 = vmatpush.bf16.msra.mxu0 %v522_v36  ;;  %563 = vmatpush.bf16.msra.mxu1 %v523_v37  ;;  %v378_v10 = vperm.slane %v1154_v35, 1 }
  0xb1   : > { %951 = vmatpush.bf16.msk.msra.mxu3 %vm1228_vm6, %v950_v39  ;;  %947 = vmatpush.bf16.msk.msra.mxu2 %vm1228_vm6, %v946_v40 }
  0xb2   : > { %v389_v41 = vpop.permute.xlu1 %388  ;;  %v1238_v45 = vpop.permute.xlu0 %386  ;;  %601 = vperm.xlu2 %981, %v598_v27   ;;  %983 = vset.pattern.permute.xlu1 %v1001_v29 }
  0xb3   : > { %v1242_v48 = vpop.permute.xlu2 %344  ;;  %v393_v50 = vsel %vm392_vm7, %v389_v41, %v1174_v51  ;;  %v394_v52 = vsel %vm392_vm7, %v1238_v45, %v389_v41  ;;  %v418_v41 = vperm.slane %v1120_v19, 3 }
  0xb4   : > { %v404_v57 = vmul.f32 %v400_v46, %v393_v50  ;;  %v403_v60 = vmul.f32 %v399_v7, %v394_v52  ;;  %v419_v52 = vperm.slane %v1149_v34, 3 }
  0xba   : > { %v410_v53 = vpop.permute.xlu1 %409  ;;  %v408_v54 = vpop.permute.xlu0 %407 }
  0xbb   : > { %v414_v55 = vsel %vm413_vm8, %v410_v53, %v1225_v32  ;;  %v415_v56 = vsel %vm413_vm8, %v408_v54, %v410_v53  ;;  %v368_v8 = vpop.permute.xlu2 %367  ;;  %v358_v53 = vperm.slane %v1127_v21, 0 }
  0xbc   : > { %v425_v61 = vmul.f32 %v421_v5, %v414_v55  ;;  %v424_v62 = vmul.f32 %v420_v49, %v415_v56  ;;  %v397_v55 = vperm.slane %v1120_v19, 2 }
  0xbe   : > { %v516_v0 = vpack.c.bf16 %v424_v62, %v403_v60  ;;  %v517_v1 = vpack.c.bf16 %v425_v61, %v404_v57  ;;  %v398_v57 = vperm.slane %v1149_v34, 2  ;;  %v379_v60 = vperm.slane %v1127_v21, 1  ;;  %v339_v61 = vld [vmem:[%s1615_s2] sm:$0xf] }
  0xc0   : > { %578 = vmatpush.bf16.msra.mxu2 %v516_v0  ;;  %591 = vmatpush.bf16.msra.mxu3 %v517_v1 }
  0xc2   : > { %v1269_v14 = vpop.permute.xlu1 %342  ;;  %v429_v15 = vpop.permute.xlu0 %428 }
  0xc3   : > { %v436_v17 = vsel %vm434_vm4, %v429_v15, %v1115_v18  ;;  %v437_v24 = vsel %vm434_vm4, %v1113_v16, %v429_v15  ;;  %v352_v12 = vsel %vm350_vm9, %v1269_v14, %v1242_v48  ;;  %v406_v39 = vpop.permute.xlu2 %405 }
  0xc4   : > { %v443_v28 = vmul.f32 %v439_v6, %v437_v24  ;;  %v444_v18 = vmul.f32 %v440_v13, %v436_v17  ;;  %v361_v37 = vmul.f32 %v357_v31, %v352_v12  ;;  %v417_v38 = vsel %vm413_vm8, %v1225_v32, %v406_v39 }
  0xc5   : > { %v416_v56 = vsel %vm413_vm8, %v406_v39, %v408_v54  ;;  %v422_v62 = vmul.f32 %v418_v41, %v417_v38 }
  0xc6   : > { %v938_v16 = vpack.c.bf16 %v443_v28, %v1061_v2  ;;  %v942_v30 = vpack.c.bf16 %v444_v18, %v1063_v3  ;;  %v423_v54 = vmul.f32 %v419_v52, %v416_v56  ;;  %v377_v18 = vperm.slane %v1149_v34, 1 }
  0xc8   : > { %939 = vmatpush.bf16.msk.msra.mxu0 %vm1228_vm6, %v938_v16  ;;  %943 = vmatpush.bf16.msk.msra.mxu1 %vm1228_vm6, %v942_v30  ;;  %v355_v16 = vperm.slane %v1120_v19, 0  ;;  %v356_v30 = vperm.slane %v1149_v34, 0 }
  0xca   : > { %v366_v2 = vpop.permute.xlu1 %365  ;;  %v347_v36 = vpop.permute.xlu0 %346 }
  0xcb   : > { %v373_v3 = vsel %vm371_vm10, %v366_v2, %v368_v8  ;;  %v351_v32 = vsel %vm350_vm9, %v1242_v48, %v347_v36 }
  0xcc   : > { %v382_v40 = vmul.f32 %v378_v10, %v373_v3  ;;  %v362_v48 = vmul.f32 %v358_v53, %v351_v32 }
  0xce   : > { %v512_v50 = vpack.c.bf16 %v382_v40, %v361_v37 }
  0xd0   : > { %579 = vmatpush.bf16.msra.mxu2 %v512_v50 }
  0xd2   : > { %v385_v0 = vpop.permute.xlu1 %384  ;;  %v370_v1 = vpop.permute.xlu0 %369 }
  0xd3   : > { %v395_v15 = vsel %vm392_vm7, %v385_v0, %v1238_v45  ;;  %v396_v17 = vsel %vm392_vm7, %v1174_v51, %v385_v0  ;;  %v372_v24 = vsel %vm371_vm10, %v368_v8, %v370_v1  ;;  %948 = vmatmul.msk.bf16.vlgmr.msra.gmra.mxu2 %vm530_vm11, %v339_v61  ;;  %v376_v8 = vperm.slane %v1120_v19, 1 }
  0xd4   : > { %v401_v25 = vmul.f32 %v397_v55, %v396_v17  ;;  %v402_v27 = vmul.f32 %v398_v57, %v395_v15  ;;  %v383_v45 = vmul.f32 %v379_v60, %v372_v24 }
  0xd6   : > { %v514_v28 = vpack.c.bf16 %v422_v62, %v401_v25  ;;  %v515_v29 = vpack.c.bf16 %v423_v54, %v402_v27  ;;  %v513_v51 = vpack.c.bf16 %v383_v45, %v362_v48 }
  0xd8   : > { %552 = vmatpush.bf16.msra.mxu0 %v514_v28  ;;  %565 = vmatpush.bf16.msra.mxu1 %v515_v29 }
  0xd9   : > { %592 = vmatpush.bf16.msra.mxu3 %v513_v51 }
  0xda   : > { %v364_v12 = vpop.permute.xlu1 %363  ;;  %v341_v3 = vpop.permute.xlu0 %340 }
  0xdb   : > { %v374_v37 = vsel %vm371_vm10, %v364_v12, %v366_v2  ;;  %v375_v39 = vsel %vm371_vm10, %v370_v1, %v364_v12  ;;  %v353_v40 = vsel %vm350_vm9, %v341_v3, %v1269_v14  ;;  %v354_v50 = vsel %vm350_vm9, %v347_v36, %v341_v3 }
  0xdc   : > { %v380_v38 = vmul.f32 %v376_v8, %v375_v39  ;;  %v381_v56 = vmul.f32 %v377_v18, %v374_v37  ;;  %v359_v32 = vmul.f32 %v355_v16, %v354_v50  ;;  %v360_v2 = vmul.f32 %v356_v30, %v353_v40  ;;  %952 = vmatmul.msk.bf16.vlgmr.msra.gmra.mxu3 %vm530_vm11, %v339_v61 }
  0xde   : > { %v510_v62 = vpack.c.bf16 %v380_v38, %v359_v32  ;;  %v511_v0 = vpack.c.bf16 %v381_v56, %v360_v2  ;;  %v848_v56 = vld [vmem:[%s1620_s7] sm:$0xff] }
  0xe0   : > { %553 = vmatpush.bf16.msra.mxu0 %v510_v62  ;;  %566 = vmatpush.bf16.msra.mxu1 %v511_v0 }
  0xe3   : > { %940 = vmatmul.msk.bf16.vlgmr.msra.gmra.mxu0 %vm530_vm11, %v339_v61  ;;  %944 = vmatmul.msk.bf16.vlgmr.msra.gmra.mxu1 %vm530_vm11, %v339_v61 }
 0x10c   : > { %v602_v36 = vpop.permute.xlu2 %601 }
 0x121   : > { %v612_v15 = vpop.permute.xlu0 %611 }
 0x156   : > { %v581_v14 = vpop.f32.mrf.mxu2 }
 0x157   : > { %v606_v40 = vmul.f32 %v602_v36, %v581_v14 }
 0x159   : > { %v616_v50 = vadd.f32 %v612_v15, %v606_v40 }
 0x15b   : > { %v1399_v38 = vmax.f32 %v616_v50, 0.0 }
 0x15e   : > { %v583_v1 = vpop.f32.mrf.mxu2 }
 0x15f   : > { %v594_v54 = vpop.f32.mrf.mxu3 }
 0x160   : > { %v555_v17 = vpop.f32.mrf.mxu0  ;;  %v568_v24 = vpop.f32.mrf.mxu1  ;;  %v607_v3 = vmul.f32 %v602_v36, %v594_v54 }
 0x161   : > { %v604_v48 = vmul.f32 %v602_v36, %v555_v17  ;;  %v605_v27 = vmul.f32 %v602_v36, %v568_v24 }
 0x162   : > { %v617_v37 = vadd.f32 %v612_v15, %v607_v3 }
 0x163   : > { %v614_v25 = vadd.f32 %v612_v15, %v604_v48  ;;  %v615_v51 = vadd.f32 %v612_v15, %v605_v27 }
 0x164   : > { %v1385_v39 = vmax.f32 %v617_v37, 0.0 }
 0x165   : > { %v1369_v45 = vmax.f32 %v614_v25, 0.0  ;;  %v1377_v12 = vmax.f32 %v615_v51, 0.0 }
 0x167   : > { %687 = vrot.lane.b32.xlu0 %v1369_v45, %s994_s14  ;;  %703 = vrot.lane.b32.xlu2 %v1369_v45, %s992_s12  ;;  %v596_v28 = vpop.f32.mrf.mxu3 }
 0x168   : > { %735 = vrot.lane.b32.xlu1 %v1369_v45, %s993_s13  ;;  %v557_v61 = vpop.f32.mrf.mxu0  ;;  %v570_v29 = vpop.f32.mrf.mxu1 }
 0x16f   : > { %705 = vrot.lane.b32.xlu0 %v1377_v12, %s992_s12  ;;  %719 = vrot.lane.b32.xlu2 %v1369_v45, %s995_s15 }
 0x170   : > { %721 = vrot.lane.b32.xlu1 %v1377_v12, %s995_s15 }
 0x177   : > { %625 = vrot.lane.b32.xlu0 %v1377_v12, %s998_s18  ;;  %737 = vrot.lane.b32.xlu2 %v1377_v12, %s993_s13 }
 0x178   : > { %741 = vrot.lane.b32.xlu1 %v1385_v39, %s993_s13 }
 0x17f   : > { %641 = vrot.lane.b32.xlu0 %v1377_v12, %s999_s19  ;;  %657 = vrot.lane.b32.xlu2 %v1377_v12, %s996_s16 }
 0x180   : > { %709 = vrot.lane.b32.xlu1 %v1385_v39, %s992_s12 }
 0x187   : > { %707 = vrot.lane.b32.xlu0 %v1399_v38, %s992_s12  ;;  %673 = vrot.lane.b32.xlu2 %v1377_v12, %s997_s17 }
 0x188   : > { %725 = vrot.lane.b32.xlu1 %v1385_v39, %s995_s15 }
 0x18f   : > { %723 = vrot.lane.b32.xlu0 %v1399_v38, %s995_s15  ;;  %689 = vrot.lane.b32.xlu2 %v1377_v12, %s994_s14 }
 0x190   : > { %691 = vrot.lane.b32.xlu1 %v1399_v38, %s994_s14 }
 0x197   : > { %659 = vrot.lane.b32.xlu0 %v1399_v38, %s996_s16  ;;  %739 = vrot.lane.b32.xlu2 %v1399_v38, %s993_s13 }
 0x198   : > { %661 = vrot.lane.b32.xlu1 %v1385_v39, %s996_s16 }
 0x19f   : > { %675 = vrot.lane.b32.xlu0 %v1399_v38, %s997_s17  ;;  %693 = vrot.lane.b32.xlu2 %v1385_v39, %s994_s14 }
 0x1a0   : > { %677 = vrot.lane.b32.xlu1 %v1385_v39, %s997_s17 }
 0x1a7   : > { %655 = vrot.lane.b32.xlu0 %v1369_v45, %s996_s16  ;;  %629 = vrot.lane.b32.xlu2 %v1385_v39, %s998_s18 }
 0x1a8   : > { %627 = vrot.lane.b32.xlu1 %v1399_v38, %s998_s18 }
 0x1af   : > { %639 = vrot.lane.b32.xlu0 %v1369_v45, %s999_s19  ;;  %645 = vrot.lane.b32.xlu2 %v1385_v39, %s999_s19 }
 0x1b0   : > { %643 = vrot.lane.b32.xlu1 %v1399_v38, %s999_s19 }
 0x1b7   : > { %623 = vrot.lane.b32.xlu2 %v1369_v45, %s998_s18  ;;  %s962_s18 = sshll.u32 %s1625_s29, 4 }
 0x1b8   : > { %671 = vrot.lane.b32.xlu1 %v1369_v45, %s997_s17  ;;  %s312_s23 = scalar_lea.vmem %s1621_s8, %s962_s18 }
 0x1bf   : > { %851 = vperm.xlu2 %981, %v848_v56  }
 0x1c1   : > { %v704_v32 = vpop.permute.xlu2 %703 }
 0x1c9   : > { %v720_v2 = vpop.permute.xlu2 %719 }
 0x1d1   : > { %v738_v62 = vpop.permute.xlu2 %737 }
 0x1d9   : > { %v688_v0 = vpop.permute.xlu0 %687  ;;  %v1444_v14 = vpop.permute.xlu2 %657 }
 0x1da   : > { %v736_v36 = vpop.permute.xlu1 %735 }
 0x1db   : > { %v745_v1 = vsel %vm497_vm1, %v736_v36, %v738_v62 }
 0x1dc   : > { %v747_v54 = vmul.f32 %v745_v1, %v502_v22 }
 0x1de   : > { %v767_v15 = vpack.c.bf16 %v747_v54, %v747_v54 }
 0x1e0   : > { %v775_v17 = vsel %vm334_vm0, %v767_v15, 0 }
 0x1e1   : > { %789 = vmatpush.bf16.msrb.mxu0 %v775_v17  ;;  %v706_v24 = vpop.permute.xlu0 %705  ;;  %v1451_v48 = vpop.permute.xlu2 %673 }
 0x1e2   : > { %v713_v25 = vsel %vm455_vm3, %v704_v32, %v706_v24  ;;  %v722_v27 = vpop.permute.xlu1 %721 }
 0x1e3   : > { %v715_v28 = vmul.f32 %v713_v25, %v460_v63  ;;  %v729_v61 = vsel %vm476_vm2, %v720_v2, %v722_v27 }
 0x1e4   : > { %v731_v22 = vmul.f32 %v729_v61, %v481_v58 }
 0x1e6   : > { %v763_v29 = vpack.c.bf16 %v731_v22, %v715_v28 }
 0x1e8   : > { %790 = vmatpush.bf16.msrb.mxu0 %v763_v29 }
 0x1e9   : > { %v1461_v51 = vpop.permute.xlu0 %625  ;;  %v690_v3 = vpop.permute.xlu2 %689 }
 0x1ea   : > { %v697_v37 = vsel %vm434_vm4, %v688_v0, %v690_v3  ;;  %v742_v40 = vpop.permute.xlu1 %741 }
 0x1eb   : > { %v699_v50 = vmul.f32 %v697_v37, %v439_v6  ;;  %v746_v63 = vsel %vm497_vm1, %v742_v40, %v736_v36 }
 0x1ec   : > { %v750_v56 = vmul.f32 %v746_v63, %v505_v23 }
 0x1ed   : > { %v759_v58 = vpack.c.bf16 %v699_v50, %v1369_v45 }
 0x1ee   : > { %v770_v1 = vpack.c.bf16 %v750_v56, %v750_v56 }
 0x1ef   : > { %791 = vmatpush.bf16.msrb.mxu0 %v759_v58 }
 0x1f0   : > { %v784_v54 = vsel %vm334_vm0, %v770_v1, 0 }
 0x1f1   : > { %828 = vmatpush.bf16.msrb.mxu3 %v784_v54  ;;  %v1473_v15 = vpop.permute.xlu0 %641  ;;  %v740_v17 = vpop.permute.xlu2 %739 }
 0x1f2   : > { %v743_v25 = vsel %vm497_vm1, %v740_v17, %v742_v40  ;;  %v744_v6 = vsel %vm497_vm1, %v738_v62, %v740_v17  ;;  %v710_v36 = vpop.permute.xlu1 %709 }
 0x1f3   : > { %v748_v23 = vmul.f32 %v744_v6, %v503_v42  ;;  %v749_v45 = vmul.f32 %v743_v25, %v504_v43  ;;  %v714_v37 = vsel %vm455_vm3, %v710_v36, %v704_v32 }
 0x1f4   : > { %v718_v63 = vmul.f32 %v714_v37, %v463_v33 }
 0x1f5   : > { %v768_v28 = vpack.c.bf16 %v748_v23, %v748_v23  ;;  %v769_v61 = vpack.c.bf16 %v749_v45, %v749_v45 }
 0x1f7   : > { %v778_v22 = vsel %vm334_vm0, %v768_v28, 0  ;;  %v781_v29 = vsel %vm334_vm0, %v769_v61, 0 }
 0x1f8   : > { %802 = vmatpush.bf16.msrb.mxu1 %v778_v22  ;;  %815 = vmatpush.bf16.msrb.mxu2 %v781_v29 }
 0x1f9   : > { %v708_v40 = vpop.permute.xlu0 %707  ;;  %v694_v62 = vpop.permute.xlu2 %693 }
 0x1fa   : > { %v726_v50 = vpop.permute.xlu1 %725  ;;  %v698_v42 = vsel %vm434_vm4, %v694_v62, %v688_v0  ;;  %v712_v58 = vsel %vm455_vm3, %v706_v24, %v708_v40  ;;  %v711_v54 = vsel %vm455_vm3, %v708_v40, %v710_v36 }
 0x1fb   : > { %v730_v43 = vsel %vm476_vm2, %v726_v50, %v720_v2  ;;  %v702_v32 = vmul.f32 %v698_v42, %v442_v11  ;;  %v716_v2 = vmul.f32 %v712_v58, %v461_v4  ;;  %v717_v33 = vmul.f32 %v711_v54, %v462_v44 }
 0x1fc   : > { %v734_v56 = vmul.f32 %v730_v43, %v484_v26 }
 0x1fd   : > { %v762_v11 = vpack.c.bf16 %v702_v32, %v1385_v39 }
 0x1fe   : > { %v766_v1 = vpack.c.bf16 %v734_v56, %v718_v63 }
 0x200   : > { %829 = vmatpush.bf16.msrb.mxu3 %v766_v1 }
 0x201   : > { %v724_v0 = vpop.permute.xlu0 %723 }
 0x202   : > { %v727_v26 = vsel %vm476_vm2, %v724_v0, %v726_v50  ;;  %v728_v24 = vsel %vm476_vm2, %v722_v27, %v724_v0  ;;  %v692_v17 = vpop.permute.xlu1 %691  ;;  %v630_v50 = vpop.permute.xlu2 %629 }
 0x203   : > { %v732_v25 = vmul.f32 %v728_v24, %v482_v59  ;;  %v733_v6 = vmul.f32 %v727_v26, %v483_v47  ;;  %v695_v4 = vsel %vm434_vm4, %v692_v17, %v694_v62  ;;  %v696_v44 = vsel %vm434_vm4, %v690_v3, %v692_v17  ;;  %v622_v17 = vld [vmem:[%s1618_s5] sm:$0xf] }
 0x204   : > { %830 = vmatpush.bf16.msrb.mxu3 %v762_v11  ;;  %v700_v36 = vmul.f32 %v696_v44, %v440_v13  ;;  %v701_v27 = vmul.f32 %v695_v4, %v441_v9 }
 0x205   : > { %v764_v39 = vpack.c.bf16 %v732_v25, %v716_v2  ;;  %v765_v23 = vpack.c.bf16 %v733_v6, %v717_v33 }
 0x206   : > { %v760_v47 = vpack.c.bf16 %v700_v36, %v1377_v12  ;;  %v761_v45 = vpack.c.bf16 %v701_v27, %v1399_v38 }
 0x207   : > { %803 = vmatpush.bf16.msrb.mxu1 %v764_v39  ;;  %816 = vmatpush.bf16.msrb.mxu2 %v765_v23 }
 0x209   : > { %v660_v59 = vpop.permute.xlu0 %659 }
 0x20a   : > { %v662_v28 = vpop.permute.xlu1 %661  ;;  %v664_v3 = vsel %vm392_vm7, %v1444_v14, %v660_v59  ;;  %v646_v63 = vpop.permute.xlu2 %645 }
 0x20b   : > { %804 = vmatpush.bf16.msrb.mxu1 %v760_v47  ;;  %817 = vmatpush.bf16.msrb.mxu2 %v761_v45  ;;  %v663_v13 = vsel %vm392_vm7, %v660_v59, %v662_v28  ;;  %v669_v12 = vmul.f32 %v664_v3, %v399_v7  ;;  %v838_v7 = vld [vmem:[%s1619_s6] sm:$0xff] }
 0x20c   : > { %v670_v37 = vmul.f32 %v663_v13, %v400_v46  ;;  %841 = vperm.xlu1 %983, %v838_v7  }
 0x211   : > { %v676_v9 = vpop.permute.xlu0 %675 }
 0x212   : > { %v680_v61 = vsel %vm413_vm8, %v1451_v48, %v676_v9  ;;  %v678_v22 = vpop.permute.xlu1 %677 }
 0x213   : > { %v685_v38 = vmul.f32 %v680_v61, %v420_v49  ;;  %v679_v29 = vsel %vm413_vm8, %v676_v9, %v678_v22 }
 0x214   : > { %v686_v40 = vmul.f32 %v679_v29, %v421_v5 }
 0x215   : > { %v757_v62 = vpack.c.bf16 %v685_v38, %v669_v12 }
 0x216   : > { %v758_v42 = vpack.c.bf16 %v686_v40, %v670_v37 }
 0x217   : > { %818 = vmatpush.bf16.msrb.mxu2 %v757_v62 }
 0x218   : > { %831 = vmatpush.bf16.msrb.mxu3 %v758_v42 }
 0x219   : > { %v656_v43 = vpop.permute.xlu0 %655 }
 0x21a   : > { %v628_v49 = vpop.permute.xlu1 %627  ;;  %v666_v35 = vsel %vm392_vm7, %v662_v28, %v656_v43 }
 0x21b   : > { %v631_v56 = vsel %vm350_vm9, %v628_v49, %v630_v50  ;;  %v632_v46 = vsel %vm350_vm9, %v1461_v51, %v628_v49 }
 0x21c   : > { %v637_v1 = vmul.f32 %v632_v46, %v357_v31  ;;  %v638_v54 = vmul.f32 %v631_v56, %v358_v53  ;;  %v665_v31 = vsel %vm392_vm7, %v656_v43, %v1444_v14  ;;  %v667_v14 = vmul.f32 %v666_v35, %v397_v55 }
 0x221   : > { %v640_v24 = vpop.permute.xlu0 %639 }
 0x222   : > { %v644_v5 = vpop.permute.xlu1 %643  ;;  %v649_v21 = vsel %vm371_vm10, %v640_v24, %v1473_v15 }
 0x223   : > { %v647_v58 = vsel %vm371_vm10, %v644_v5, %v646_v63  ;;  %v648_v32 = vsel %vm371_vm10, %v1473_v15, %v644_v5  ;;  %v668_v15 = vmul.f32 %v665_v31, %v398_v57  ;;  %v652_v55 = vmul.f32 %v649_v21, %v377_v18 }
 0x224   : > { %v653_v2 = vmul.f32 %v648_v32, %v378_v10  ;;  %v654_v0 = vmul.f32 %v647_v58, %v379_v60  ;;  %v624_v10 = vpop.permute.xlu2 %623  ;;  %v650_v60 = vsel %vm371_vm10, %v646_v63, %v640_v24 }
 0x225   : > { %v634_v44 = vsel %vm350_vm9, %v630_v50, %v624_v10  ;;  %v651_v36 = vmul.f32 %v650_v60, %v376_v8 }
 0x226   : > { %v753_v33 = vpack.c.bf16 %v653_v2, %v637_v1  ;;  %v754_v26 = vpack.c.bf16 %v654_v0, %v638_v54 }
 0x228   : > { %819 = vmatpush.bf16.msrb.mxu2 %v753_v33  ;;  %832 = vmatpush.bf16.msrb.mxu3 %v754_v26 }
 0x22a   : > { %v672_v53 = vpop.permute.xlu1 %671 }
 0x22b   : > { %v681_v11 = vsel %vm413_vm8, %v672_v53, %v1451_v48  ;;  %v682_v25 = vsel %vm413_vm8, %v678_v22, %v672_v53  ;;  %955 = vmatmul.msk.bf16.vlgmr.msrb.gmra.mxu2 %vm530_vm11, %v622_v17  ;;  %956 = vmatmul.msk.bf16.vlgmr.msrb.gmra.mxu3 %vm530_vm11, %v622_v17  ;;  %v633_v48 = vsel %vm350_vm9, %v624_v10, %v1461_v51 }
 0x22c   : > { %v683_v6 = vmul.f32 %v682_v25, %v418_v41  ;;  %v684_v4 = vmul.f32 %v681_v11, %v419_v52  ;;  %v635_v41 = vmul.f32 %v634_v44, %v355_v16  ;;  %v636_v52 = vmul.f32 %v633_v48, %v356_v30  ;;  %v852_v34 = vpop.permute.xlu2 %851 }
 0x22e   : > { %v755_v57 = vpack.c.bf16 %v683_v6, %v667_v14  ;;  %v756_v27 = vpack.c.bf16 %v684_v4, %v668_v15  ;;  %v751_v51 = vpack.c.bf16 %v651_v36, %v635_v41  ;;  %v752_v20 = vpack.c.bf16 %v652_v55, %v636_v52 }
 0x230   : > { %792 = vmatpush.bf16.msrb.mxu0 %v755_v57  ;;  %805 = vmatpush.bf16.msrb.mxu1 %v756_v27 }
 0x234   : > { %793 = vmatpush.bf16.msrb.mxu0 %v751_v51  ;;  %806 = vmatpush.bf16.msrb.mxu1 %v752_v20 }
 0x237   : > { %953 = vmatmul.msk.bf16.vlgmr.msrb.gmra.mxu0 %vm530_vm11, %v622_v17  ;;  %954 = vmatmul.msk.bf16.vlgmr.msrb.gmra.mxu1 %vm530_vm11, %v622_v17 }
 0x27e   : > { %v842_v39 = vpop.permute.xlu1 %841 }
 0x2ae   : > { %v821_v8 = vpop.f32.mrf.mxu2  ;;  %v834_v18 = vpop.f32.mrf.mxu3 }
 0x2af   : > { %v846_v23 = vmul.f32 %v842_v39, %v821_v8  ;;  %v847_v19 = vmul.f32 %v842_v39, %v834_v18 }
 0x2b1   : > { %v856_v45 = vadd.f32 %v852_v34, %v846_v23  ;;  %v857_v61 = vadd.f32 %v852_v34, %v847_v19 }
 0x2b3   : > { %v860_v38 = vmax.f32 %v856_v45, 0.0  ;;  %v861_v29 = vmax.f32 %v857_v61, 0.0 }
 0x2b4   : > { %v795_v16 = vpop.f32.mrf.mxu0  ;;  %v808_v59 = vpop.f32.mrf.mxu1 }
 0x2b5   : > { %v844_v30 = vmul.f32 %v842_v39, %v795_v16  ;;  %v845_v47 = vmul.f32 %v842_v39, %v808_v59  ;;  %957 = vst [vmem:[%s312_s23 + $0x10] sm:$0xff] %v860_v38 }
 0x2b6   : > { %v823_v28 = vpop.f32.mrf.mxu2  ;;  %v836_v3 = vpop.f32.mrf.mxu3  ;;  %958 = vst [vmem:[%s312_s23 + $0x18] sm:$0xff] %v861_v29 }
 0x2b7   : > { %v854_v13 = vadd.f32 %v852_v34, %v844_v30  ;;  %v855_v9 = vadd.f32 %v852_v34, %v845_v47 }
 0x2b9   : > { %v858_v22 = vmax.f32 %v854_v13, 0.0  ;;  %v859_v12 = vmax.f32 %v855_v9, 0.0 }
 0x2bb   : > { %862 = vst [vmem:[%s312_s23] sm:$0xff] %v858_v22 }
 0x2bc   : > { %v797_v37 = vpop.f32.mrf.mxu0  ;;  %v810_v40 = vpop.f32.mrf.mxu1  ;;  %863 = vst [vmem:[%s312_s23 + $0x8] sm:$0xff] %v859_v12 }
 0x2bd PF: > { %s18_s27 = sadd.s32 1, %s990_s27  }
 0x2be   : > { %p15_p4 = scmp.ge.s32.totalorder %s18_s27, 4  }
 0x2c0   :  { %17 = sbr.rel (!%p15_p4) target bundleno = 1 (0x1), region = 84 }

</bundles_post_ra>
